<compile_context>
chip_gen: v7x
topology: tpu7x:2x2x1
jax: 0.10.0
libtpu: 0.0.40
codegen_flags: <defaults>
</compile_context>

<pallas_src>
import math

import jax
import jax.numpy as jnp
from jax import lax
from jax.experimental import pallas as pl
from jax.experimental.pallas import tpu as pltpu


# ---------------------------------------------------------------------------
# Kernel
# ---------------------------------------------------------------------------

def _bin_half_kernel(x_ref, bn_scale_ref, bn_shift_ref, in_w_ref, in_b_ref, o_ref,
                     *, half1, cb, eps, inv_hw):
    """Fused half-BN / half-IN normalization for one (nb, cb, HW) block.

    x_ref:        (nb, cb, HW)  slab of the input
    bn_scale_ref: (cb, 1)       weight / sqrt(running_var + eps)   (0 on IN channels)
    bn_shift_ref: (cb, 1)       bias - running_mean * scale        (0 on IN channels)
    in_w_ref:     (cb, 1)       IN affine weight (1 on BN channels)
    in_b_ref:     (cb, 1)       IN affine bias   (0 on BN channels)
    """
    x = x_ref[...].astype(jnp.float32)                        # (nb, cb, HW)

    # Instance-norm statistics over the lane (HW) axis, f32 accumulation. For the BN
    # channels inside this block the reductions are wasted XLU work, but the op is
    # HBM-bound so the XLU slot is free filler; the single-pass layout avoids any
    # extra HBM traffic or a second kernel.
    mean = jnp.sum(x, axis=-1, keepdims=True) * inv_hw        # (nb, cb, 1)
    xc = x - mean
    var = jnp.sum(xc * xc, axis=-1, keepdims=True) * inv_hw   # biased var (F.instance_norm)
    inv = lax.rsqrt(var + eps)                                # EUP slot
    in_scale = inv * in_w_ref[...]                            # (nb, cb, 1)
    in_shift = in_b_ref[...] - mean * in_scale                # (nb, cb, 1)

    # Channel mask: global channel index < half1  ->  BatchNorm path.
    c0 = pl.program_id(1) * cb
    ch = c0 + lax.broadcasted_iota(jnp.int32, (1, cb, 1), 1)
    is_bn = ch < half1

    scale = jnp.where(is_bn, bn_scale_ref[...], in_scale)
    shift = jnp.where(is_bn, bn_shift_ref[...], in_shift)
    o_ref[...] = (x * scale + shift).astype(o_ref.dtype)


# ---------------------------------------------------------------------------
# Wrapper
# ---------------------------------------------------------------------------

def _divisors(n):
    return [d for d in range(1, n + 1) if n % d == 0]


def meta_bin_half_forward(
    inputs,
    bn_weight, bn_bias, bn_running_mean, bn_running_var,
    in_weight=None, in_bias=None,
    *,
    eps=1e-5,
    in_fc_multiply=0.0,
    block_bytes_target=2 << 20,   # ~2 MiB per block: 4x double-buffered ~= 8 MiB VMEM
):
    """Pallas implementation of Meta_bin_half.forward (opt=None / eval path)."""
    N, C, H, W = inputs.shape
    half1 = math.ceil(C / 2)
    half2 = C - half1
    HW = H * W
    itemsize = jnp.dtype(inputs.dtype).itemsize

    # --- Fold eval-mode BN into a per-channel affine (hoisted once; never recomputed). ---
    bn_scale = (bn_weight.astype(jnp.float32)
                / jnp.sqrt(bn_running_var.astype(jnp.float32) + eps))
    bn_shift = bn_bias.astype(jnp.float32) - bn_running_mean.astype(jnp.float32) * bn_scale

    # --- Degenerate 1x1 spatial: module multiplies the IN half by in_fc_multiply. ---
    if HW == 1:
        xb = inputs[:, :half1].astype(jnp.float32)
        bn = xb * bn_scale[None, :, None, None] + bn_shift[None, :, None, None]
        xi = inputs[:, half1:].astype(jnp.float32) * in_fc_multiply
        return jnp.concatenate([bn, xi], axis=1).astype(inputs.dtype)

    # --- IN affine params, padded to full C (BN channels ignore them via the mask). ---
    in_w = jnp.ones((half2,), jnp.float32) if in_weight is None \
        else in_weight.astype(jnp.float32)
    in_b = jnp.zeros((half2,), jnp.float32) if in_bias is None \
        else in_bias.astype(jnp.float32)

    bn_scale_full = jnp.concatenate([bn_scale, jnp.zeros((half2,), jnp.float32)]).reshape(C, 1)
    bn_shift_full = jnp.concatenate([bn_shift, jnp.zeros((half2,), jnp.float32)]).reshape(C, 1)
    in_w_full = jnp.concatenate([jnp.ones((half1,), jnp.float32), in_w]).reshape(C, 1)
    in_b_full = jnp.concatenate([jnp.zeros((half1,), jnp.float32), in_b]).reshape(C, 1)

    # Lane-dense layout: spatial axis last (contiguous reshape, no transpose).
    # NOTE: if HW is not a multiple of 128 (e.g. 7x7, 14x14 ResNet tails), the stores are
    # masked; we do NOT pad HW because that would add an extra XLA pass and corrupt IN stats.
    x3 = inputs.reshape(N, C, HW)

    # --- Block selection: dtype-aware sublane requirement, VMEM-budgeted batch blocking. ---
    sublane = 8 * max(1, 4 // itemsize)        # 8 (f32) / 16 (bf16) / 32 (int8, fp8)
    cb_cands = [d for d in _divisors(C) if d % sublane == 0]
    if not cb_cands:
        cb = C                                  # full channel dim: exempt from (8,128) rule
    else:
        fitting = [d for d in cb_cands if d * HW * itemsize <= block_bytes_target]
        cb = max(fitting) if fitting else min(cb_cands)
    # TODO(synk): for pathologically large H*W (single (cb_min, HW) slab > VMEM budget) an
    # HW-tiled two-pass variant (sum/sumsq accumulators + pl.when finalize) would be needed.

    nb_cands = [d for d in _divisors(N) if d * cb * HW * itemsize <= block_bytes_target]
    nb = max(nb_cands) if nb_cands else 1

    grid = (N // nb, C // cb)

    import functools
    kernel = functools.partial(
        _bin_half_kernel,
        half1=int(half1), cb=int(cb), eps=float(eps), inv_hw=1.0 / float(HW))

    out3 = pl.pallas_call(
        kernel,
        out_shape=jax.ShapeDtypeStruct((N, C, HW), inputs.dtype),
        grid=grid,
        in_specs=[
            pl.BlockSpec((nb, cb, HW), lambda n, c: (n, c, 0)),
            pl.BlockSpec((cb, 1), lambda n, c: (c, 0)),
            pl.BlockSpec((cb, 1), lambda n, c: (c, 0)),
            pl.BlockSpec((cb, 1), lambda n, c: (c, 0)),
            pl.BlockSpec((cb, 1), lambda n, c: (c, 0)),
        ],
        out_specs=pl.BlockSpec((nb, cb, HW), lambda n, c: (n, c, 0)),
        compiler_params=pltpu.CompilerParams(
            dimension_semantics=("parallel", "parallel")),
        cost_estimate=pl.CostEstimate(
            flops=6 * N * C * HW,
            transcendentals=N * C,
            bytes_accessed=2 * N * C * HW * itemsize + 16 * C),
    )(x3, bn_scale_full, bn_shift_full, in_w_full, in_b_full)

    return out3.reshape(N, C, H, W)


# ---------------------------------------------------------------------------
# Pure-JAX reference (matches the PyTorch module's opt=None / eval forward)
# ---------------------------------------------------------------------------

def meta_bin_half_reference(inputs, bn_w, bn_b, bn_rm, bn_rv,
                            in_w=None, in_b=None, *, eps=1e-5):
    N, C, H, W = inputs.shape
    half1 = math.ceil(C / 2)
    xb = inputs[:, :half1].astype(jnp.float32)
    xi = inputs[:, half1:].astype(jnp.float32)

    bn = (xb - bn_rm[None, :, None, None]) * \
        (1.0 / jnp.sqrt(bn_rv + eps))[None, :, None, None]
    bn = bn * bn_w[None, :, None, None] + bn_b[None, :, None, None]

    mean = xi.mean(axis=(2, 3), keepdims=True)
    var = ((xi - mean) ** 2).mean(axis=(2, 3), keepdims=True)
    ins = (xi - mean) / jnp.sqrt(var + eps)
    if in_w is not None:
        ins = ins * in_w[None, :, None, None] + in_b[None, :, None, None]

    return jnp.concatenate([bn, ins], axis=1).astype(inputs.dtype)


# ---------------------------------------------------------------------------
# Self-test
# ---------------------------------------------------------------------------

if __name__ == "__main__":
    # Small shapes consistent with the module: batch=2, channels=4, spatial 16x16.
    N, C, H, W = 2, 4, 16, 16
    half1 = math.ceil(C / 2)
    half2 = C - half1
    eps = 1e-5

    key = jax.random.PRNGKey(0)
    k_x, k_w, k_b, k_rm, k_rv, k_iw, k_ib = jax.random.split(key, 7)

    x = jax.random.normal(k_x, (N, C, H, W), dtype=jnp.float32)

    # BatchNorm half parameters/buffers (non-trivial values to exercise the math;
    # module init would be weight=1, bias=0, running_mean=0, running_var=1).
    bn_weight = 1.0 + 0.1 * jax.random.normal(k_w, (half1,), dtype=jnp.float32)
    bn_bias = 0.1 * jax.random.normal(k_b, (half1,), dtype=jnp.float32)
    bn_running_mean = 0.2 * jax.random.normal(k_rm, (half1,), dtype=jnp.float32)
    bn_running_var = 1.0 + 0.1 * jax.random.uniform(k_rv, (half1,), dtype=jnp.float32)

    # InstanceNorm half affine (weight=1, bias=0 at module init; kept general here).
    in_weight = 1.0 + 0.1 * jax.random.normal(k_iw, (half2,), dtype=jnp.float32)
    in_bias = 0.1 * jax.random.normal(k_ib, (half2,), dtype=jnp.float32)

    out = meta_bin_half_forward(
        x, bn_weight, bn_bias, bn_running_mean, bn_running_var,
        in_weight, in_bias, eps=eps)
    out = jax.block_until_ready(out)

    ref = meta_bin_half_reference(
        x, bn_weight, bn_bias, bn_running_mean, bn_running_var,
        in_weight, in_bias, eps=eps)

    assert out.shape == (N, C, H, W)
    assert jnp.allclose(out, ref, atol=1e-4, rtol=1e-4), "mismatch vs reference"

    # TODO(synk): the meta-learning branch (update_parameter / autograd.grad on meta_loss),
    # training-mode batch statistics ('general'/'hold' running-stat updates) and the
    # per-domain 'each_domain' split have no Pallas forward equivalent; only the
    # opt=None / eval-mode forward (running-stats BN + instance norm) is kernelized.
    print("KERNEL_OK")
</pallas_src>

<mosaic_0001>
module attributes {stable_mosaic.version = 11 : i64} {
  func.func @_bin_half_kernel(%arg0: i32, %arg1: i32, %arg2: memref<2x4x256xf32, #tpu.memory_space<vmem>>, %arg3: memref<4x1xf32, #tpu.memory_space<vmem>>, %arg4: memref<4x1xf32, #tpu.memory_space<vmem>>, %arg5: memref<4x1xf32, #tpu.memory_space<vmem>>, %arg6: memref<4x1xf32, #tpu.memory_space<vmem>>, %arg7: memref<2x4x256xf32, #tpu.memory_space<vmem>>) attributes {dimension_semantics = [#tpu.dimension_semantics<parallel>, #tpu.dimension_semantics<parallel>], iteration_bounds = array<i64: 1, 1>, scalar_prefetch = 0 : i64, scratch_operands = 0 : i64, tpu.core_type = #tpu.core_type<tc>, window_params = [{transform_indices = @transform_0, window_bounds = array<i64: 2, 4, 256>}, {transform_indices = @transform_1, window_bounds = array<i64: 4, 1>}, {transform_indices = @transform_2, window_bounds = array<i64: 4, 1>}, {transform_indices = @transform_3, window_bounds = array<i64: 4, 1>}, {transform_indices = @transform_4, window_bounds = array<i64: 4, 1>}, {transform_indices = @transform_5, window_bounds = array<i64: 2, 4, 256>}]} {
    %c0 = arith.constant 0 : index
    %c0_0 = arith.constant 0 : index
    %c0_1 = arith.constant 0 : index
    %0 = vector.load %arg2[%c0, %c0_0, %c0_1] : memref<2x4x256xf32, #tpu.memory_space<vmem>>, vector<2x4x256xf32>
    %cst = arith.constant dense<0.000000e+00> : vector<2x4xf32>
    %1 = vector.multi_reduction <add>, %0, %cst [2] : vector<2x4x256xf32> to vector<2x4xf32>
    %2 = vector.shape_cast %1 : vector<2x4xf32> to vector<2x4x1xf32>
    %cst_2 = arith.constant 3.906250e-03 : f32
    %3 = vector.broadcast %cst_2 : f32 to vector<2x4x1xf32>
    %4 = arith.mulf %2, %3 : vector<2x4x1xf32>
    %5 = vector.broadcast %4 : vector<2x4x1xf32> to vector<2x4x256xf32>
    %6 = arith.subf %0, %5 : vector<2x4x256xf32>
    %7 = arith.mulf %6, %6 : vector<2x4x256xf32>
    %cst_3 = arith.constant dense<0.000000e+00> : vector<2x4xf32>
    %8 = vector.multi_reduction <add>, %7, %cst_3 [2] : vector<2x4x256xf32> to vector<2x4xf32>
    %9 = vector.shape_cast %8 : vector<2x4xf32> to vector<2x4x1xf32>
    %cst_4 = arith.constant 3.906250e-03 : f32
    %10 = vector.broadcast %cst_4 : f32 to vector<2x4x1xf32>
    %11 = arith.mulf %9, %10 : vector<2x4x1xf32>
    %cst_5 = arith.constant 9.99999974E-6 : f32
    %12 = vector.broadcast %cst_5 : f32 to vector<2x4x1xf32>
    %13 = arith.addf %11, %12 : vector<2x4x1xf32>
    %14 = math.rsqrt %13 : vector<2x4x1xf32>
    %c0_6 = arith.constant 0 : index
    %c0_7 = arith.constant 0 : index
    %15 = vector.load %arg5[%c0_6, %c0_7] : memref<4x1xf32, #tpu.memory_space<vmem>>, vector<4x1xf32>
    %16 = vector.shape_cast %15 : vector<4x1xf32> to vector<1x4x1xf32>
    %17 = vector.broadcast %16 : vector<1x4x1xf32> to vector<2x4x1xf32>
    %18 = arith.mulf %14, %17 : vector<2x4x1xf32>
    %c0_8 = arith.constant 0 : index
    %c0_9 = arith.constant 0 : index
    %19 = vector.load %arg6[%c0_8, %c0_9] : memref<4x1xf32, #tpu.memory_space<vmem>>, vector<4x1xf32>
    %20 = arith.mulf %4, %18 : vector<2x4x1xf32>
    %21 = vector.shape_cast %19 : vector<4x1xf32> to vector<1x4x1xf32>
    %22 = vector.broadcast %21 : vector<1x4x1xf32> to vector<2x4x1xf32>
    %23 = arith.subf %22, %20 : vector<2x4x1xf32>
    %c4_i32 = arith.constant 4 : i32
    %24 = arith.muli %arg1, %c4_i32 : i32
    %25 = tpu.iota {dimensions = array<i32: 1>} : vector<1x4x1xi32>
    %26 = vector.broadcast %24 : i32 to vector<1x4x1xi32>
    %27 = arith.addi %26, %25 : vector<1x4x1xi32>
    %c2_i32 = arith.constant 2 : i32
    %28 = vector.broadcast %c2_i32 : i32 to vector<1x4x1xi32>
    %29 = arith.cmpi slt, %27, %28 : vector<1x4x1xi32>
    %c0_10 = arith.constant 0 : index
    %c0_11 = arith.constant 0 : index
    %30 = vector.load %arg3[%c0_10, %c0_11] : memref<4x1xf32, #tpu.memory_space<vmem>>, vector<4x1xf32>
    %31 = vector.shape_cast %29 : vector<1x4x1xi1> to vector<1x4x1xi1>
    %32 = vector.broadcast %31 : vector<1x4x1xi1> to vector<2x4x1xi1>
    %33 = vector.shape_cast %30 : vector<4x1xf32> to vector<1x4x1xf32>
    %34 = vector.broadcast %33 : vector<1x4x1xf32> to vector<2x4x1xf32>
    %35 = arith.select %32, %34, %18 : vector<2x4x1xi1>, vector<2x4x1xf32>
    %c0_12 = arith.constant 0 : index
    %c0_13 = arith.constant 0 : index
    %36 = vector.load %arg4[%c0_12, %c0_13] : memref<4x1xf32, #tpu.memory_space<vmem>>, vector<4x1xf32>
    %37 = vector.shape_cast %29 : vector<1x4x1xi1> to vector<1x4x1xi1>
    %38 = vector.broadcast %37 : vector<1x4x1xi1> to vector<2x4x1xi1>
    %39 = vector.shape_cast %36 : vector<4x1xf32> to vector<1x4x1xf32>
    %40 = vector.broadcast %39 : vector<1x4x1xf32> to vector<2x4x1xf32>
    %41 = arith.select %38, %40, %23 : vector<2x4x1xi1>, vector<2x4x1xf32>
    %42 = vector.broadcast %35 : vector<2x4x1xf32> to vector<2x4x256xf32>
    %43 = arith.mulf %0, %42 : vector<2x4x256xf32>
    %44 = vector.broadcast %41 : vector<2x4x1xf32> to vector<2x4x256xf32>
    %45 = arith.addf %43, %44 : vector<2x4x256xf32>
    %c0_14 = arith.constant 0 : index
    %c0_15 = arith.constant 0 : index
    %c0_16 = arith.constant 0 : index
    %46 = vector.load %arg7[%c0_14, %c0_15, %c0_16] : memref<2x4x256xf32, #tpu.memory_space<vmem>>, vector<2x4x256xf32>
    tpu.vector_store %arg7[%c0_14, %c0_15, %c0_16], %45 {strides = array<i32>} : memref<2x4x256xf32, #tpu.memory_space<vmem>>, vector<2x4x256xf32>,
    return
  }
  func.func @transform_0(%arg0: i32, %arg1: i32) -> (i32, i32, i32) {
    %c0_i32 = arith.constant 0 : i32
    %c0_i32_0 = arith.constant 0 : i32
    return %arg0, %arg1, %c0_i32 : i32, i32, i32
  }
  func.func @transform_1(%arg0: i32, %arg1: i32) -> (i32, i32) {
    %c0_i32 = arith.constant 0 : i32
    %c0_i32_0 = arith.constant 0 : i32
    return %arg1, %c0_i32 : i32, i32
  }
  func.func @transform_2(%arg0: i32, %arg1: i32) -> (i32, i32) {
    %c0_i32 = arith.constant 0 : i32
    %c0_i32_0 = arith.constant 0 : i32
    return %arg1, %c0_i32 : i32, i32
  }
  func.func @transform_3(%arg0: i32, %arg1: i32) -> (i32, i32) {
    %c0_i32 = arith.constant 0 : i32
    %c0_i32_0 = arith.constant 0 : i32
    return %arg1, %c0_i32 : i32, i32
  }
  func.func @transform_4(%arg0: i32, %arg1: i32) -> (i32, i32) {
    %c0_i32 = arith.constant 0 : i32
    %c0_i32_0 = arith.constant 0 : i32
    return %arg1, %c0_i32 : i32, i32
  }
  func.func @transform_5(%arg0: i32, %arg1: i32) -> (i32, i32, i32) {
    %c0_i32 = arith.constant 0 : i32
    %c0_i32_0 = arith.constant 0 : i32
    return %arg0, %arg1, %c0_i32 : i32, i32, i32
  }
}

</mosaic_0001>

<bundles_post_ra>
// kernel: tpu_custom_call.1
= control target key start
LH: loop header
LB: loop body
LE: loop exit
PB: predicated region body
PF: predicated region fallthrough
CT: control target
= control target key end

     0   :  { %vm29_vm0 = vcmask 1043456   ;;  %s314_s0 = inlined_call_operand.vmem [shape: f32[2,4,256], index: 0, kind: input, shape index: {}]   ;;  %s315_s1 = inlined_call_operand.vmem [shape: f32[4,1], index: 1, kind: input, shape index: {}]   ;;  %s316_s2 = inlined_call_operand.vmem [shape: f32[4,1], index: 2, kind: input, shape index: {}]   ;;  %s317_s3 = inlined_call_operand.vmem [shape: f32[4,1], index: 3, kind: input, shape index: {}]   ;;  %s318_s4 = inlined_call_operand.vmem [shape: f32[4,1], index: 4, kind: input, shape index: {}]   ;;  %s319_s5 = inlined_call_operand.hbm [shape: f32[2,4,256], index: 5, kind: output, shape index: {}]  }
   0x1   :  { %v253_v0 = vld [vmem:[%s314_s0] sm:$0xff]  ;;  %v258_v1 = vld [vmem:[%s314_s0 + $0x8] sm:$0xff] }
   0x2   :  { %v25_v2 = vcombine.high %v253_v0, %v253_v0  ;;  %v30_v3 = vsel %vm29_vm0, %v253_v0, 0.0  ;;  %v26_v4 = vcombine.high %v258_v1, %v258_v1 }
   0x3   :  { %10 = vsyncpa [#allocation3], 0  ;;  %v35_v6 = vsel %vm29_vm0, %v258_v1, 0.0  ;;  %v215_v10 = vmov 839922192   ;;  %v47_v12 = vlaneseq  ;;  %v216_v34 = vmov 0  }
   0x4   :  { %v31_v5 = vsel %vm29_vm0, %v25_v2, 0.0  ;;  %v36_v7 = vsel %vm29_vm0, %v26_v4, 0.0  ;;  %v45_v11 = vunpack.c.l.s4 %v215_v10  ;;  %183 = vset.pattern.permute.xlu0 %v216_v34  ;;  %184 = vset.pattern.permute.xlu1 %v216_v34  ;;  %v86_v41 = vld [vmem:[%s317_s3] sm:$0xf] }
   0x5   :  { %v32_v8 = vadd.f32 %v31_v5, %v30_v3  ;;  %v37_v9 = vadd.f32 %v36_v7, %v35_v6  ;;  %v48_v14 = vshrl.u32 %v47_v12, 7  ;;  %v100_v43 = vld [vmem:[%s315_s1] sm:$0xf]  ;;  %s217_s1 = smov [#allocation2]  }
   0x6   :  { %v46_v13 = vunpack.c.0.s8 %v45_v11  ;;  %v89_v48 = vld [vmem:[%s318_s4] sm:$0xf] }
   0x7   :  { %33 = vadd.xlane.f32.xlu0 %v32_v8  ;;  %vm99_vm1 = vcmp.lt.s32.totalorder %v48_v14, 2  ;;  %v105_v53 = vld [vmem:[%s316_s2] sm:$0xf]  ;;  %s167_s2 = sshll.u32 %s217_s1, 4  ;;  %s168_s2 = int_to_ptr.vmem [resolvable:$true] %s167_s2 }
   0x8   :  { %v270_v15 = vsub.s32 %v46_v13, %v48_v14  ;;  %s191_s4 = scalar_lea.vmem %s168_s2, 256  ;;  %p196_p1 = scmp.lt.s32.totalorder %s168_s2, %s168_s2 }
   0x9   :  { %p192_p0 = scmp.ne.s32.totalorder %s168_s2, %s191_s4  ;;  %p197_p2 = scmp.lt.s32.totalorder %s191_s4, %s191_s4 }
   0xb   :  { %38 = vadd.xlane.f32.xlu0 %v37_v9  ;;  %p198_p3 = por %p197_p2, %p196_p1 }
   0xd   :  { %p199_p4 = pnand %p198_p3, %p192_p0 }
  0x94   :  { %v34_v16 = vpop.xlane.xlu0 %33 }
  0x95   :  { %v40_v17 = vmul.f32 0.00390625, %v34_v16 }
  0x97   :  { %v50_v18 = vrot.slane %v40_v17, %v270_v15 }
  0x98   :  { %v39_v19 = vpop.xlane.xlu0 %38 }
  0x99   :  { %v41_v20 = vmul.f32 0.00390625, %v39_v19  ;;  %v60_v21 = vsub.f32 %v253_v0, %v50_v18 }
  0x9b   :  { %v57_v22 = vrot.slane %v41_v20, %v270_v15  ;;  %v62_v23 = vmul.f32 %v60_v21, %v60_v21 }
  0x9d   :  { %v61_v24 = vsub.f32 %v258_v1, %v57_v22  ;;  %v66_v25 = vcombine.high %v62_v23, %v62_v23  ;;  %v70_v26 = vsel %vm29_vm0, %v62_v23, 0.0 }
  0x9f   :  { %v71_v27 = vsel %vm29_vm0, %v66_v25, 0.0  ;;  %v63_v28 = vmul.f32 %v61_v24, %v61_v24 }
  0xa0   :  { %v72_v29 = vadd.f32 %v71_v27, %v70_v26 }
  0xa1   :  { %v67_v30 = vcombine.high %v63_v28, %v63_v28  ;;  %v75_v31 = vsel %vm29_vm0, %v63_v28, 0.0 }
  0xa2   :  { %73 = vadd.xlane.f32.xlu1 %v72_v29 }
  0xa3   :  { %v76_v32 = vsel %vm29_vm0, %v67_v30, 0.0 }
  0xa4   :  { %v77_v33 = vadd.f32 %v76_v32, %v75_v31 }
  0xa6   :  { %78 = vadd.xlane.f32.xlu1 %v77_v33 }
 0x12f   :  { %v74_v35 = vpop.xlane.xlu1 %73 }
 0x130   :  { %v80_v36 = vmul.f32 0.00390625, %v74_v35 }
 0x132   :  { %v82_v37 = vadd.f32 1e-05, %v80_v36 }
 0x133   :  { %v79_v38 = vpop.xlane.xlu1 %78 }
 0x134   :  { %187 = vrsqrt.f32 %v82_v37  ;;  %v81_v39 = vmul.f32 0.00390625, %v79_v38 }
 0x136   :  { %v83_v40 = vadd.f32 1e-05, %v81_v39 }
 0x138   :  { %189 = vrsqrt.f32 %v83_v40 }
 0x13e   :  { %v188_v42 = vpop.eup %187 }
 0x13f   :  { %v87_v44 = vmul.f32 %v188_v42, %v86_v41 }
 0x141   :  { %v103_v45 = vsel %vm99_vm1, %v100_v43, %v87_v44  ;;  %v90_v46 = vmul.f32 %v87_v44, %v40_v17 }
 0x142   :  { %v190_v47 = vpop.eup %189  ;;  %110 = vperm.xlu0 %183, %v103_v45  }
 0x143   :  { %v88_v49 = vmul.f32 %v190_v47, %v86_v41  ;;  %v92_v51 = vsub.f32 %v89_v48, %v90_v46 }
 0x145   :  { %v104_v50 = vsel %vm99_vm1, %v100_v43, %v88_v49  ;;  %v91_v52 = vmul.f32 %v88_v49, %v41_v20  ;;  %v106_v54 = vsel %vm99_vm1, %v105_v53, %v92_v51 }
 0x146   :  { %114 = vperm.xlu1 %184, %v104_v50  }
 0x147   :  { %v93_v55 = vsub.f32 %v89_v48, %v91_v52 }
 0x149   :  { %v107_v56 = vsel %vm99_vm1, %v105_v53, %v93_v55 }
 0x14a   :  { %136 = vperm.xlu1 %184, %v106_v54  }
 0x14e   :  { %140 = vperm.xlu1 %184, %v107_v56  }
 0x1c1   :  { %v111_v57 = vpop.permute.xlu0 %110 }
 0x1c2   :  { %v122_v59 = vrot.slane %v111_v57, %v270_v15 }
 0x1c4   :  { %v132_v61 = vmul.f32 %v122_v59, %v253_v0 }
 0x1c5   :  { %v115_v58 = vpop.permute.xlu1 %114 }
 0x1c6   :  { %v129_v62 = vrot.slane %v115_v58, %v270_v15 }
 0x1c8   :  { %v133_v4 = vmul.f32 %v129_v62, %v258_v1 }
 0x1c9   :  { %v137_v60 = vpop.permute.xlu1 %136 }
 0x1ca   :  { %v148_v63 = vrot.slane %v137_v60, %v270_v15 }
 0x1cc   :  { %v158_v2 = vadd.f32 %v148_v63, %v132_v61 }
 0x1cd   :  { %v141_v3 = vpop.permute.xlu1 %140 }
 0x1ce   :  { %160 = vst [vmem:[#allocation2] sm:$0xff] %v158_v2  ;;  %v155_v5 = vrot.slane %v141_v3, %v270_v15 }
 0x1d0   :  { %v159_v6 = vadd.f32 %v155_v5, %v133_v4 }
 0x1d2   :  { %161 = vst [vmem:[#allocation2 + $0x8] sm:$0xff] %v159_v6 }
 0x1d3   :  { %202 = shalt.err (!%p199_p4)
}
 0x1d4   :  { %s203_s30 = scalar_lea.hbm %s319_s5, 256 }
 0x1d5   :  { %p204_p5 = scmp.ne.s32.totalorder %s319_s5, %s203_s30  ;;  %p207_p6 = scmp.lt.u32.totalorder %s203_s30, %s319_s5 }
 0x1d7   :  { %p209_p7 = pnand %p207_p6, %p204_p5 }
 0x1d9   :  { %212 = shalt.err (!%p209_p7)
}
 0x1da   :  { %s218_s10 = smov 128   ;;  %s219_s11 = smov 8  }
 0x1db   :  { %173 = dma.vmem_to_hbm [thread:$0]  %s168_s2, 256, %s319_s5, [#allocation3], %s218_s10, %s218_s10, %s219_s11  }
 0x1dc   :  { %213 = dma.done.wait [#allocation3], 256  }
 0x1dd   :  { %214 = vsyncadd [#allocation3], 4294967040 }
 0x1de   :  { %177 = vsyncpa [#allocation3], 1 }

</bundles_post_ra>
